<compile_context>
chip_gen: v7x
topology: tpu7x:2x2x1
jax: 0.10.0
libtpu: 0.0.40
codegen_flags: <defaults>
</compile_context>

<pallas_src>
import functools

import jax
import jax.numpy as jnp
from jax.experimental import pallas as pl
from jax.experimental.pallas import tpu as pltpu

N_INPUTS, N_HIDDEN, N_ACTIONS = 29, 96, 18
K_PAD, H_PAD, OUT_PAD = 32, 128, 128  # padded feature widths (lane-friendly)


def mlp_kernel(x_ref, w1_ref, b1_ref, w2_ref, b2_ref, w3_ref, b3_ref, o_ref):
    # x_ref: (TB, K_PAD) bf16; w*: bf16; b*: (1, 128) f32; o_ref: (TB, 128) f32.
    x = x_ref[...]
    h1 = jnp.tanh(
        jnp.dot(x, w1_ref[...], preferred_element_type=jnp.float32) + b1_ref[...]
    ).astype(jnp.bfloat16)
    h2 = jnp.tanh(
        jnp.dot(h1, w2_ref[...], preferred_element_type=jnp.float32) + b2_ref[...]
    ).astype(jnp.bfloat16)
    o_ref[...] = (
        jnp.dot(h2, w3_ref[...], preferred_element_type=jnp.float32) + b3_ref[...]
    )


def _round_up(v, m):
    return (v + m - 1) // m * m


def _pad2(a, rows, cols):
    return jnp.zeros((rows, cols), a.dtype).at[: a.shape[0], : a.shape[1]].set(a)


@functools.partial(jax.jit, static_argnames=("block_b",))
def pytorch_mlp_forward(x, w1, b1, w2, b2, w3, b3, *, block_b=512):
    """x: (B, n_inputs) f32. Weights as (in, out); biases as (1, out). Returns (B, n_actions) f32."""
    B, _ = x.shape
    n_actions = w3.shape[1]

    # Zero-pad feature dims to lane-friendly sizes (exact), cast matmul operands to bf16.
    w1p = _pad2(w1, K_PAD, H_PAD).astype(jnp.bfloat16)
    w2p = _pad2(w2, H_PAD, H_PAD).astype(jnp.bfloat16)
    w3p = _pad2(w3, H_PAD, OUT_PAD).astype(jnp.bfloat16)
    b1p = _pad2(b1, 1, H_PAD)
    b2p = _pad2(b2, 1, H_PAD)
    b3p = _pad2(b3, 1, OUT_PAD)

    # Batch tiling: big tiles for pipeline-overhead amortization; tiny batches -> one block.
    tb = block_b if B >= block_b else _round_up(B, 16)
    b_pad = _round_up(B, tb)
    xp = _pad2(x, b_pad, K_PAD).astype(jnp.bfloat16)

    grid = (b_pad // tb,)
    out = pl.pallas_call(
        mlp_kernel,
        out_shape=jax.ShapeDtypeStruct((b_pad, OUT_PAD), jnp.float32),
        grid=grid,
        in_specs=[
            pl.BlockSpec((tb, K_PAD), lambda i: (i, 0)),        # x: tiled over batch
            pl.BlockSpec((K_PAD, H_PAD), lambda i: (0, 0)),      # w1: resident
            pl.BlockSpec((1, H_PAD), lambda i: (0, 0)),          # b1: resident
            pl.BlockSpec((H_PAD, H_PAD), lambda i: (0, 0)),      # w2: resident
            pl.BlockSpec((1, H_PAD), lambda i: (0, 0)),          # b2: resident
            pl.BlockSpec((H_PAD, OUT_PAD), lambda i: (0, 0)),    # w3: resident
            pl.BlockSpec((1, OUT_PAD), lambda i: (0, 0)),        # b3: resident
        ],
        out_specs=pl.BlockSpec((tb, OUT_PAD), lambda i: (i, 0)),  # lane-dense (128) output
        compiler_params=pltpu.CompilerParams(
            dimension_semantics=("parallel",)  # megacore: split batch blocks across TCs (v7x)
        ),
    )(xp, w1p, b1p, w2p, b2p, w3p, b3p)

    return out[:B, :n_actions]


def init_params(key, n_inputs=N_INPUTS, n_hidden=N_HIDDEN, n_actions=N_ACTIONS):
    """Deterministic init mimicking PyTorch Linear default (uniform +/- 1/sqrt(fan_in))."""
    keys = jax.random.split(key, 6)

    def linear(kw, kb, fan_in, fan_out):
        bound = 1.0 / jnp.sqrt(fan_in)
        w = jax.random.uniform(kw, (fan_in, fan_out), jnp.float32, -bound, bound)
        b = jax.random.uniform(kb, (1, fan_out), jnp.float32, -bound, bound)
        return w, b

    w1, b1 = linear(keys[0], keys[1], n_inputs, n_hidden)
    w2, b2 = linear(keys[2], keys[3], n_hidden, n_hidden)
    w3, b3 = linear(keys[4], keys[5], n_hidden, n_actions)
    return w1, b1, w2, b2, w3, b3


def reference_forward(x, w1, b1, w2, b2, w3, b3):
    h1 = jnp.tanh(x @ w1 + b1)
    h2 = jnp.tanh(h1 @ w2 + b2)
    return h2 @ w3 + b3


if __name__ == "__main__":
    key = jax.random.PRNGKey(0)
    kx, kp = jax.random.split(key)
    params = init_params(kp)

    # B=8: single-block path (launch-overhead regime); B=640: multi-step grid + batch padding.
    for B in (8, 640):
        x = jax.random.normal(jax.random.fold_in(kx, B), (B, N_INPUTS), jnp.float32)
        out = jax.block_until_ready(pytorch_mlp_forward(x, *params))
        ref = reference_forward(x, *params)
        assert out.shape == (B, N_ACTIONS), out.shape
        # bf16 matmul operands with f32 accumulation -> loosened tolerance vs f32 reference.
        assert jnp.allclose(out, ref, atol=3e-2, rtol=3e-2), "mismatch vs JAX reference"

    print("KERNEL_OK")
</pallas_src>

<mosaic_0001>
module attributes {stable_mosaic.version = 11 : i64} {
  func.func @mlp_kernel(%arg0: i32, %arg1: memref<16x32xbf16, #tpu.memory_space<vmem>>, %arg2: memref<32x128xbf16, #tpu.memory_space<vmem>>, %arg3: memref<1x128xf32, #tpu.memory_space<vmem>>, %arg4: memref<128x128xbf16, #tpu.memory_space<vmem>>, %arg5: memref<1x128xf32, #tpu.memory_space<vmem>>, %arg6: memref<128x128xbf16, #tpu.memory_space<vmem>>, %arg7: memref<1x128xf32, #tpu.memory_space<vmem>>, %arg8: memref<16x128xf32, #tpu.memory_space<vmem>>) attributes {dimension_semantics = [#tpu.dimension_semantics<parallel>], iteration_bounds = array<i64: 1>, scalar_prefetch = 0 : i64, scratch_operands = 0 : i64, tpu.core_type = #tpu.core_type<tc>, window_params = [{transform_indices = @transform_0, window_bounds = array<i64: 16, 32>}, {pipeline_mode = #tpu.pipeline_mode<synchronous>, transform_indices = @transform_1, window_bounds = array<i64: 32, 128>}, {pipeline_mode = #tpu.pipeline_mode<synchronous>, transform_indices = @transform_2, window_bounds = array<i64: 1, 128>}, {pipeline_mode = #tpu.pipeline_mode<synchronous>, transform_indices = @transform_3, window_bounds = array<i64: 128, 128>}, {pipeline_mode = #tpu.pipeline_mode<synchronous>, transform_indices = @transform_4, window_bounds = array<i64: 1, 128>}, {pipeline_mode = #tpu.pipeline_mode<synchronous>, transform_indices = @transform_5, window_bounds = array<i64: 128, 128>}, {pipeline_mode = #tpu.pipeline_mode<synchronous>, transform_indices = @transform_6, window_bounds = array<i64: 1, 128>}, {transform_indices = @transform_7, window_bounds = array<i64: 16, 128>}]} {
    %c0 = arith.constant 0 : index
    %c0_0 = arith.constant 0 : index
    %0 = vector.load %arg1[%c0, %c0_0] : memref<16x32xbf16, #tpu.memory_space<vmem>>, vector<16x32xbf16>
    %c0_1 = arith.constant 0 : index
    %c0_2 = arith.constant 0 : index
    %1 = vector.load %arg2[%c0_1, %c0_2] : memref<32x128xbf16, #tpu.memory_space<vmem>>, vector<32x128xbf16>
    %cst = arith.constant dense<0.000000e+00> : vector<16x128xf32>
    %2 = tpu.matmul %0, %1, %cst {dimension_numbers = #tpu.dot_dimension_numbers<[1], [0], [0], [1], [0, 0, 1, 1], [], []>} : vector<16x32xbf16>, vector<32x128xbf16>, vector<16x128xf32> -> vector<16x128xf32>
    %c0_3 = arith.constant 0 : index
    %c0_4 = arith.constant 0 : index
    %3 = vector.load %arg3[%c0_3, %c0_4] : memref<1x128xf32, #tpu.memory_space<vmem>>, vector<1x128xf32>
    %4 = vector.broadcast %3 : vector<1x128xf32> to vector<16x128xf32>
    %5 = arith.addf %2, %4 : vector<16x128xf32>
    %6 = math.tanh %5 : vector<16x128xf32>
    %7 = arith.truncf %6 : vector<16x128xf32> to vector<16x128xbf16>
    %c0_5 = arith.constant 0 : index
    %c0_6 = arith.constant 0 : index
    %8 = vector.load %arg4[%c0_5, %c0_6] : memref<128x128xbf16, #tpu.memory_space<vmem>>, vector<128x128xbf16>
    %cst_7 = arith.constant dense<0.000000e+00> : vector<16x128xf32>
    %9 = tpu.matmul %7, %8, %cst_7 {dimension_numbers = #tpu.dot_dimension_numbers<[1], [0], [0], [1], [0, 0, 1, 1], [], []>} : vector<16x128xbf16>, vector<128x128xbf16>, vector<16x128xf32> -> vector<16x128xf32>
    %c0_8 = arith.constant 0 : index
    %c0_9 = arith.constant 0 : index
    %10 = vector.load %arg5[%c0_8, %c0_9] : memref<1x128xf32, #tpu.memory_space<vmem>>, vector<1x128xf32>
    %11 = vector.broadcast %10 : vector<1x128xf32> to vector<16x128xf32>
    %12 = arith.addf %9, %11 : vector<16x128xf32>
    %13 = math.tanh %12 : vector<16x128xf32>
    %14 = arith.truncf %13 : vector<16x128xf32> to vector<16x128xbf16>
    %c0_10 = arith.constant 0 : index
    %c0_11 = arith.constant 0 : index
    %15 = vector.load %arg6[%c0_10, %c0_11] : memref<128x128xbf16, #tpu.memory_space<vmem>>, vector<128x128xbf16>
    %cst_12 = arith.constant dense<0.000000e+00> : vector<16x128xf32>
    %16 = tpu.matmul %14, %15, %cst_12 {dimension_numbers = #tpu.dot_dimension_numbers<[1], [0], [0], [1], [0, 0, 1, 1], [], []>} : vector<16x128xbf16>, vector<128x128xbf16>, vector<16x128xf32> -> vector<16x128xf32>
    %c0_13 = arith.constant 0 : index
    %c0_14 = arith.constant 0 : index
    %17 = vector.load %arg7[%c0_13, %c0_14] : memref<1x128xf32, #tpu.memory_space<vmem>>, vector<1x128xf32>
    %18 = vector.broadcast %17 : vector<1x128xf32> to vector<16x128xf32>
    %19 = arith.addf %16, %18 : vector<16x128xf32>
    %c0_15 = arith.constant 0 : index
    %c0_16 = arith.constant 0 : index
    %20 = vector.load %arg8[%c0_15, %c0_16] : memref<16x128xf32, #tpu.memory_space<vmem>>, vector<16x128xf32>
    tpu.vector_store %arg8[%c0_15, %c0_16], %19 {strides = array<i32>} : memref<16x128xf32, #tpu.memory_space<vmem>>, vector<16x128xf32>,
    return
  }
  func.func @transform_0(%arg0: i32) -> (i32, i32) {
    %c0_i32 = arith.constant 0 : i32
    %c0_i32_0 = arith.constant 0 : i32
    return %arg0, %c0_i32 : i32, i32
  }
  func.func @transform_1(%arg0: i32) -> (i32, i32) {
    %c0_i32 = arith.constant 0 : i32
    %c0_i32_0 = arith.constant 0 : i32
    %c0_i32_1 = arith.constant 0 : i32
    return %c0_i32, %c0_i32_0 : i32, i32
  }
  func.func @transform_2(%arg0: i32) -> (i32, i32) {
    %c0_i32 = arith.constant 0 : i32
    %c0_i32_0 = arith.constant 0 : i32
    %c0_i32_1 = arith.constant 0 : i32
    return %c0_i32, %c0_i32_0 : i32, i32
  }
  func.func @transform_3(%arg0: i32) -> (i32, i32) {
    %c0_i32 = arith.constant 0 : i32
    %c0_i32_0 = arith.constant 0 : i32
    %c0_i32_1 = arith.constant 0 : i32
    return %c0_i32, %c0_i32_0 : i32, i32
  }
  func.func @transform_4(%arg0: i32) -> (i32, i32) {
    %c0_i32 = arith.constant 0 : i32
    %c0_i32_0 = arith.constant 0 : i32
    %c0_i32_1 = arith.constant 0 : i32
    return %c0_i32, %c0_i32_0 : i32, i32
  }
  func.func @transform_5(%arg0: i32) -> (i32, i32) {
    %c0_i32 = arith.constant 0 : i32
    %c0_i32_0 = arith.constant 0 : i32
    %c0_i32_1 = arith.constant 0 : i32
    return %c0_i32, %c0_i32_0 : i32, i32
  }
  func.func @transform_6(%arg0: i32) -> (i32, i32) {
    %c0_i32 = arith.constant 0 : i32
    %c0_i32_0 = arith.constant 0 : i32
    %c0_i32_1 = arith.constant 0 : i32
    return %c0_i32, %c0_i32_0 : i32, i32
  }
  func.func @transform_7(%arg0: i32) -> (i32, i32) {
    %c0_i32 = arith.constant 0 : i32
    %c0_i32_0 = arith.constant 0 : i32
    return %arg0, %c0_i32 : i32, i32
  }
}

</mosaic_0001>

<bundles_post_ra>
// kernel: pytorch_mlp_forward.1
= control target key start
LH: loop header
LB: loop body
LE: loop exit
PB: predicated region body
PF: predicated region fallthrough
CT: control target
= control target key end

     0   :  { %v459_v0 = vmov 0.0   ;;  %vm460_vm0 = vmmov 0   ;;  %vm57_vm1 = vcmask 261120   ;;  %s597_s1 = inlined_call_operand.vmem [shape: bf16[32,128], index: 1, kind: input, shape index: {}]   ;;  %s598_s3 = inlined_call_operand.vmem [shape: bf16[128,128], index: 3, kind: input, shape index: {}]   ;;  %s599_s0 = inlined_call_operand.vmem [shape: bf16[16,32], index: 0, kind: input, shape index: {}]   ;;  %s600_s5 = inlined_call_operand.vmem [shape: bf16[128,128], index: 5, kind: input, shape index: {}]   ;;  %s601_s2 = inlined_call_operand.vmem [shape: f32[1,128], index: 2, kind: input, shape index: {}]   ;;  %s602_s4 = inlined_call_operand.vmem [shape: f32[1,128], index: 4, kind: input, shape index: {}]   ;;  %s603_s6 = inlined_call_operand.vmem [shape: f32[1,128], index: 6, kind: input, shape index: {}]   ;;  %s604_s7 = inlined_call_operand.vmem [shape: f32[16,128], index: 7, kind: output, shape index: {}]  }
   0x1   :  { %382 = vmatprep.subr.bf16.mxu0 %v459_v0  ;;  %v432_v1 = vld [vmem:[%s597_s1] sm:$0xff]   ;;  %386 = vmatprep.mubr.msk.bf16.mxu0 %vm460_vm0, %v459_v0  ;;  %v433_v2 = vld [vmem:[%s597_s1 + $0x8] sm:$0xff]   ;;  %v437_v6 = vld [vmem:[%s598_s3 + $0x10] sm:$0xff]  }
   0x2   :  { %390 = vmatprep.subr.bf16.mxu1 %v459_v0  ;;  %406 = vmatprep.mubr.msk.bf16.mxu1 %vm460_vm0, %v459_v0  ;;  %v435_v3 = vld [vmem:[%s598_s3] sm:$0xff]   ;;  %v436_v5 = vld [vmem:[%s598_s3 + $0x8] sm:$0xff]   ;;  %v438_v7 = vld [vmem:[%s598_s3 + $0x18] sm:$0xff]  }
   0x3   :  { %383 = vmatpush3.bf16.msra.mxu0 %v432_v1  ;;  %v434_v4 = vld [vmem:[%s599_s0] sm:$0xff]   ;;  %391 = vmatpush3.bf16.msra.mxu1 %v435_v3  ;;  %v440_v9 = vld [vmem:[%s598_s3 + $0x28] sm:$0xff]   ;;  %v441_v10 = vld [vmem:[%s598_s3 + $0x30] sm:$0xff]  }
   0x4   :  { %384 = vmatprep.subr.bf16.mxu0 %v459_v0  ;;  %392 = vmatprep.subr.bf16.mxu1 %v459_v0  ;;  %v439_v8 = vld [vmem:[%s598_s3 + $0x20] sm:$0xff]   ;;  %v442_v11 = vld [vmem:[%s598_s3 + $0x38] sm:$0xff]   ;;  %v444_v13 = vld [vmem:[%s600_s5 + $0x8] sm:$0xff]  }
   0x5   :  { %v443_v12 = vld [vmem:[%s600_s5] sm:$0xff]   ;;  %v445_v14 = vld [vmem:[%s600_s5 + $0x10] sm:$0xff]   ;;  %v446_v15 = vld [vmem:[%s600_s5 + $0x18] sm:$0xff]  }
   0x6   :  { %v338_v16 = vld [vmem:[%s601_s2] ss:$0 sm:$0xff]  ;;  %v448_v27 = vld [vmem:[%s600_s5 + $0x28] sm:$0xff]   ;;  %v449_v28 = vld [vmem:[%s600_s5 + $0x30] sm:$0xff]  }
   0x7   :  { %385 = vmatpush3.bf16.msra.mxu0 %v433_v2  ;;  %393 = vmatpush3.bf16.msra.mxu1 %v436_v5  ;;  %v447_v26 = vld [vmem:[%s600_s5 + $0x20] sm:$0xff]   ;;  %v450_v29 = vld [vmem:[%s600_s5 + $0x38] sm:$0xff]  }
   0x8   :  { %410 = vmatprep.subr.bf16.mxu0 %v459_v0  ;;  %394 = vmatprep.subr.bf16.mxu1 %v459_v0  ;;  %v343_v30 = vld [vmem:[%s602_s4] ss:$0 sm:$0xff] }
   0x9   :  { %v352_v40 = vld [vmem:[%s603_s6] ss:$0 sm:$0xff] }
   0xa   :  { %387 = vmatmul.mubr.msk.bf16.vlgmr.msra.gmra.mrb[0].mxu0 %vm57_vm1, %v434_v4 }
   0xb   :  { %426 = vmatprep.mubr.msk.bf16.mxu0 %vm460_vm0, %v459_v0  ;;  %395 = vmatpush3.bf16.msra.mxu1 %v437_v6 }
   0xc   :  { %396 = vmatprep.subr.bf16.mxu1 %v459_v0  ;;  %411 = vmatpush3.bf16.msra.mxu0 %v443_v12 }
   0xd   :  { %412 = vmatprep.subr.bf16.mxu0 %v459_v0 }
   0xf   :  { %397 = vmatpush3.bf16.msra.mxu1 %v438_v7 }
  0x10   :  { %398 = vmatprep.subr.bf16.mxu1 %v459_v0  ;;  %413 = vmatpush3.bf16.msra.mxu0 %v444_v13 }
  0x11   :  { %414 = vmatprep.subr.bf16.mxu0 %v459_v0 }
  0x13   :  { %399 = vmatpush3.bf16.msra.mxu1 %v439_v8 }
  0x14   :  { %400 = vmatprep.subr.bf16.mxu1 %v459_v0  ;;  %415 = vmatpush3.bf16.msra.mxu0 %v445_v14 }
  0x15   :  { %416 = vmatprep.subr.bf16.mxu0 %v459_v0 }
  0x17   :  { %401 = vmatpush3.bf16.msra.mxu1 %v440_v9 }
  0x18   :  { %402 = vmatprep.subr.bf16.mxu1 %v459_v0  ;;  %417 = vmatpush3.bf16.msra.mxu0 %v446_v15 }
  0x19   :  { %418 = vmatprep.subr.bf16.mxu0 %v459_v0 }
  0x1b   :  { %403 = vmatpush3.bf16.msra.mxu1 %v441_v10 }
  0x1c   :  { %404 = vmatprep.subr.bf16.mxu1 %v459_v0  ;;  %419 = vmatpush3.bf16.msra.mxu0 %v447_v26 }
  0x1d   :  { %420 = vmatprep.subr.bf16.mxu0 %v459_v0 }
  0x1f   :  { %405 = vmatpush3.bf16.msra.mxu1 %v442_v11 }
  0x20   :  { %421 = vmatpush3.bf16.msra.mxu0 %v448_v27 }
  0x21   :  { %422 = vmatprep.subr.bf16.mxu0 %v459_v0 }
  0x24   :  { %423 = vmatpush3.bf16.msra.mxu0 %v449_v28 }
  0x25   :  { %424 = vmatprep.subr.bf16.mxu0 %v459_v0 }
  0x28   :  { %425 = vmatpush3.bf16.msra.mxu0 %v450_v29 }
  0xdd   :  { %v95_v17 = vpop.f32.mrb[0].mxu0 }
  0xde   :  { %v96_v18 = vadd.f32 %v338_v16, %v95_v17  ;;  %v388_v19 = vpop.f32.mrb[1].mxu0 }
  0xdf   :  { %v98_v20 = vpop.f32.mrb[2].mxu0 }
  0xe0   :  { %v99_v21 = vadd.f32 %v338_v16, %v98_v20  ;;  %v389_v22 = vpop.f32.mrb[3].mxu0  ;;  %451 = vtanh.f32 %v96_v18 }
  0xe2   :  { %453 = vtanh.f32 %v99_v21 }
  0xea   :  { %v452_v23 = vpop.eup %451 }
  0xec   :  { %v454_v24 = vpop.eup %453 }
  0xed   :  { %v104_v25 = vpack.c.bf16 %v454_v24, %v452_v23 }
  0xef   :  { %407 = vmatmul.mubr.bf16.vlgmr.msra.gmra.mrb[0].mxu1 %v104_v25 }
 0x1c2   :  { %v210_v31 = vpop.f32.mrb[0].mxu1 }
 0x1c3   :  { %v211_v32 = vadd.f32 %v343_v30, %v210_v31  ;;  %v408_v33 = vpop.f32.mrb[1].mxu1 }
 0x1c4   :  { %v213_v34 = vpop.f32.mrb[2].mxu1 }
 0x1c5   :  { %v214_v35 = vadd.f32 %v343_v30, %v213_v34  ;;  %v409_v36 = vpop.f32.mrb[3].mxu1  ;;  %455 = vtanh.f32 %v211_v32 }
 0x1c7   :  { %457 = vtanh.f32 %v214_v35 }
 0x1cf   :  { %v456_v37 = vpop.eup %455 }
 0x1d1   :  { %v458_v38 = vpop.eup %457 }
 0x1d2   :  { %v219_v39 = vpack.c.bf16 %v458_v38, %v456_v37 }
 0x1d4   :  { %427 = vmatmul.mubr.bf16.vlgmr.msra.gmra.mrb[4].mxu0 %v219_v39 }
 0x2a7   :  { %v325_v41 = vpop.f32.mrb[4].mxu0 }
 0x2a8   :  { %v326_v42 = vadd.f32 %v352_v40, %v325_v41  ;;  %v428_v43 = vpop.f32.mrb[5].mxu0 }
 0x2a9   :  { %v328_v44 = vpop.f32.mrb[6].mxu0 }
 0x2aa   :  { %332 = vst [vmem:[%s604_s7] sm:$0xff] %v326_v42  ;;  %v329_v45 = vadd.f32 %v352_v40, %v328_v44  ;;  %v429_v46 = vpop.f32.mrb[7].mxu0 }
 0x2ac   :  { %333 = vst [vmem:[%s604_s7 + $0x8] sm:$0xff] %v329_v45 }

</bundles_post_ra>
